<compile_context>
chip_gen: v5e
topology: v5e:2x2
jax: 0.10.0
libtpu: 0.0.40
codegen_flags: <defaults>
</compile_context>

<pallas_src>
import functools
import math

import jax
import jax.numpy as jnp
from jax.experimental import pallas as pl
from jax.experimental.pallas import tpu as pltpu


def _block_diag_wT(W, N):
    """W: [Dout, DC] -> [N*DC, N*Dout] with N copies of W.T on the diagonal."""
    Dout, DC = W.shape
    eye = jnp.eye(N, dtype=W.dtype)
    # bd[n*DC + c, m*Dout + k] = eye[n, m] * W[k, c]
    bd = jnp.einsum('nm,kc->ncmk', eye, W)
    return bd.reshape(N * DC, N * Dout)


def _pick_block_batch(B, T, row_target=128):
    """Largest divisor Bb of B with Bb*T <= row_target MXU rows, keeping at
    least 2 grid steps when B >= 2 (so both v7x TensorCores get work)."""
    best = 1
    for bb in range(1, B + 1):
        if B % bb:
            continue
        if bb * T > row_target:
            continue
        if B >= 2 and (B // bb) < 2:
            continue
        best = bb
    return best


def _self_attention_kernel(h_ref, wq_ref, wk_ref, wv_ref, o_ref, *, scale):
    # h_ref : [Bb, T, N*DC]   lane-dense activation block (last dim = 128-mult)
    # wq_ref: [N*DC, N*DK]    block-diagonal weights (resident, constant index)
    # wk_ref: [N*DC, N*DK]
    # wv_ref: [N*DC, N*DV]
    # o_ref : [Bb, T, N*DV]   lane-dense output block
    Bb, T, NDC = h_ref.shape
    NDV = o_ref.shape[-1]

    # Stack batch rows so the three projections are single big MXU matmuls
    # with a K=NDC (=128 here) contraction and lane-dense outputs.
    h2 = h_ref[...].reshape(Bb * T, NDC)

    q = jnp.dot(h2, wq_ref[...], preferred_element_type=jnp.float32)   # [Bb*T, N*DK]
    k = jnp.dot(h2, wk_ref[...], preferred_element_type=jnp.float32)   # [Bb*T, N*DK]
    v = jnp.dot(h2, wv_ref[...], preferred_element_type=jnp.float32)   # [Bb*T, N*DV]

    q3 = q.reshape(Bb, T, -1)
    k3 = k.reshape(Bb, T, -1)
    v3 = v.reshape(Bb, T, NDV)

    # Scores: per-batch [T, T] = [T, N*DK] @ [N*DK, T]  (batched einsum on MXU).
    s = jnp.einsum('bnk,bik->bni', q3, k3,
                   preferred_element_type=jnp.float32) * scale

    # Numerically-stable softmax over the key-time axis (f32 on the VPU/EUP).
    s = s - jnp.max(s, axis=-1, keepdims=True)
    p = jnp.exp(s)
    row_sum = jnp.sum(p, axis=-1, keepdims=True)
    # approx=True would route the reciprocal to the EUP slot; kept exact here
    # to preserve f32 parity with the reference.
    p = p * pl.reciprocal(row_sum, approx=False)

    # Context: per-batch [T, N*DV] = [T, T] @ [T, N*DV]; lane-dense store.
    o = jnp.einsum('bni,bid->bnd', p, v3, preferred_element_type=jnp.float32)
    o_ref[...] = o.astype(o_ref.dtype)


def self_attention_pallas(H, WQ, WK, WV, *, use_bf16_matmul_inputs=False):
    """H: [B, T, N, DC]; WQ/WK: [DK, DC]; WV: [DV, DC] -> [B, T, N, DV]."""
    B, T, N, DC = H.shape
    DK = WQ.shape[0]
    DV = WV.shape[0]
    NDC, NDK, NDV = N * DC, N * DK, N * DV

    # Free contiguous collapse of the trailing (N, DC) dims -> no HBM transpose.
    H2 = H.reshape(B, T, NDC)

    # One-time block-diagonal weights so each projection is one lane-dense matmul.
    wq_bd = _block_diag_wT(WQ, N)   # [NDC, NDK]
    wk_bd = _block_diag_wT(WK, N)   # [NDC, NDK]
    wv_bd = _block_diag_wT(WV, N)   # [NDC, NDV]

    if use_bf16_matmul_inputs:
        # v6e/v7x MXU fast path; accumulation stays f32 inside the kernel.
        H2 = H2.astype(jnp.bfloat16)
        wq_bd = wq_bd.astype(jnp.bfloat16)
        wk_bd = wk_bd.astype(jnp.bfloat16)
        wv_bd = wv_bd.astype(jnp.bfloat16)

    Bb = _pick_block_batch(B, T)
    grid = (B // Bb,)

    kernel = functools.partial(_self_attention_kernel, scale=1.0 / math.sqrt(DK))

    out2 = pl.pallas_call(
        kernel,
        out_shape=jax.ShapeDtypeStruct((B, T, NDV), H.dtype),
        grid_spec=pltpu.PrefetchScalarGridSpec(
            num_scalar_prefetch=0,
            grid=grid,
            in_specs=[
                pl.BlockSpec((Bb, T, NDC), lambda b: (b, 0, 0)),
                pl.BlockSpec((NDC, NDK), lambda b: (0, 0)),
                pl.BlockSpec((NDC, NDK), lambda b: (0, 0)),
                pl.BlockSpec((NDC, NDV), lambda b: (0, 0)),
            ],
            out_specs=pl.BlockSpec((Bb, T, NDV), lambda b: (b, 0, 0)),
        ),
        compiler_params=pltpu.CompilerParams(
            dimension_semantics=("parallel",)),
    )(H2, wq_bd, wk_bd, wv_bd)

    # Free contiguous expand back to the PyTorch output layout.
    return out2.reshape(B, T, N, DV)


def self_attention_ref(H, WQ, WK, WV):
    """Pure-JAX reference mirroring the PyTorch forward exactly."""
    dk = WQ.shape[0]
    q = jnp.einsum('btnc,kc->btnk', H, WQ)
    k = jnp.einsum('btnc,kc->btnk', H, WK)
    v = jnp.einsum('btnc,kc->btnk', H, WV)
    s = jnp.einsum('onmk,oimk->oni', q, k) / (float(dk) ** 0.5)
    s = jax.nn.softmax(s, axis=-1)
    return jnp.einsum('onm,omki->onki', s, v)


if __name__ == "__main__":
    B, T, N, DC, DK, DV = 2, 8, 8, 16, 32, 32

    key = jax.random.PRNGKey(0)
    k_h, k_q, k_k, k_v = jax.random.split(key, 4)

    H = jax.random.normal(k_h, (B, T, N, DC), dtype=jnp.float32)
    # nn.init.normal_ (mean=0, std=1); nn.Linear weight shape is [out, in]
    WQ = jax.random.normal(k_q, (DK, DC), dtype=jnp.float32)
    WK = jax.random.normal(k_k, (DK, DC), dtype=jnp.float32)
    WV = jax.random.normal(k_v, (DV, DC), dtype=jnp.float32)

    out = self_attention_pallas(H, WQ, WK, WV)
    jax.block_until_ready(out)

    ref = self_attention_ref(H, WQ, WK, WV)
    assert out.shape == (B, T, N, DV)
    assert jnp.allclose(out, ref, atol=1e-3, rtol=1e-3)

    print("KERNEL_OK")
</pallas_src>

<mosaic_0001>
module attributes {stable_mosaic.version = 11 : i64} {
  func.func @_self_attention_kernel(%arg0: i32, %arg1: memref<1x8x128xf32, #tpu.memory_space<vmem>>, %arg2: memref<128x256xf32, #tpu.memory_space<vmem>>, %arg3: memref<128x256xf32, #tpu.memory_space<vmem>>, %arg4: memref<128x256xf32, #tpu.memory_space<vmem>>, %arg5: memref<1x8x256xf32, #tpu.memory_space<vmem>>) attributes {dimension_semantics = [#tpu.dimension_semantics<parallel>], iteration_bounds = array<i64: 2>, scalar_prefetch = 0 : i64, scratch_operands = 0 : i64, tpu.core_type = #tpu.core_type<tc>, window_params = [{transform_indices = @transform_0, window_bounds = array<i64: 1, 8, 128>}, {pipeline_mode = #tpu.pipeline_mode<synchronous>, transform_indices = @transform_1, window_bounds = array<i64: 128, 256>}, {pipeline_mode = #tpu.pipeline_mode<synchronous>, transform_indices = @transform_2, window_bounds = array<i64: 128, 256>}, {pipeline_mode = #tpu.pipeline_mode<synchronous>, transform_indices = @transform_3, window_bounds = array<i64: 128, 256>}, {transform_indices = @transform_4, window_bounds = array<i64: 1, 8, 256>}]} {
    %c0 = arith.constant 0 : index
    %c0_0 = arith.constant 0 : index
    %c0_1 = arith.constant 0 : index
    %0 = vector.load %arg1[%c0, %c0_0, %c0_1] : memref<1x8x128xf32, #tpu.memory_space<vmem>>, vector<1x8x128xf32>
    %1 = vector.shape_cast %0 : vector<1x8x128xf32> to vector<8x128xf32>
    %c0_2 = arith.constant 0 : index
    %c0_3 = arith.constant 0 : index
    %2 = vector.load %arg2[%c0_2, %c0_3] : memref<128x256xf32, #tpu.memory_space<vmem>>, vector<128x256xf32>
    %cst = arith.constant dense<0.000000e+00> : vector<8x256xf32>
    %3 = tpu.matmul %1, %2, %cst {dimension_numbers = #tpu.dot_dimension_numbers<[1], [0], [0], [1], [0, 0, 1, 1], [], []>} : vector<8x128xf32>, vector<128x256xf32>, vector<8x256xf32> -> vector<8x256xf32>
    %c0_4 = arith.constant 0 : index
    %c0_5 = arith.constant 0 : index
    %4 = vector.load %arg3[%c0_4, %c0_5] : memref<128x256xf32, #tpu.memory_space<vmem>>, vector<128x256xf32>
    %cst_6 = arith.constant dense<0.000000e+00> : vector<8x256xf32>
    %5 = tpu.matmul %1, %4, %cst_6 {dimension_numbers = #tpu.dot_dimension_numbers<[1], [0], [0], [1], [0, 0, 1, 1], [], []>} : vector<8x128xf32>, vector<128x256xf32>, vector<8x256xf32> -> vector<8x256xf32>
    %c0_7 = arith.constant 0 : index
    %c0_8 = arith.constant 0 : index
    %6 = vector.load %arg4[%c0_7, %c0_8] : memref<128x256xf32, #tpu.memory_space<vmem>>, vector<128x256xf32>
    %cst_9 = arith.constant dense<0.000000e+00> : vector<8x256xf32>
    %7 = tpu.matmul %1, %6, %cst_9 {dimension_numbers = #tpu.dot_dimension_numbers<[1], [0], [0], [1], [0, 0, 1, 1], [], []>} : vector<8x128xf32>, vector<128x256xf32>, vector<8x256xf32> -> vector<8x256xf32>
    %8 = vector.shape_cast %3 : vector<8x256xf32> to vector<1x8x256xf32>
    %9 = vector.shape_cast %5 : vector<8x256xf32> to vector<1x8x256xf32>
    %10 = vector.shape_cast %7 : vector<8x256xf32> to vector<1x8x256xf32>
    "tpu.trace_start"() <{level = 10 : i32, message = "bnk,bik->bni"}> : () -> ()
    %cst_10 = arith.constant dense<0.000000e+00> : vector<1x8x8xf32>
    %11 = tpu.matmul %8, %9, %cst_10 {dimension_numbers = #tpu.dot_dimension_numbers<[2], [2], [1], [1], [0, 0, 0, 1, 1, 1], [0], [0]>} : vector<1x8x256xf32>, vector<1x8x256xf32>, vector<1x8x8xf32> -> vector<1x8x8xf32>
    "tpu.trace_stop"() : () -> ()
    %cst_11 = arith.constant 0.176776692 : f32
    %12 = vector.broadcast %cst_11 : f32 to vector<1x8x8xf32>
    %13 = arith.mulf %11, %12 : vector<1x8x8xf32>
    %cst_12 = arith.constant dense<0xFF800000> : vector<1x8xf32>
    %14 = vector.multi_reduction <maximumf>, %13, %cst_12 [2] : vector<1x8x8xf32> to vector<1x8xf32>
    %15 = vector.shape_cast %14 : vector<1x8xf32> to vector<1x8x1xf32>
    %16 = vector.broadcast %15 : vector<1x8x1xf32> to vector<1x8x8xf32>
    %17 = arith.subf %13, %16 : vector<1x8x8xf32>
    %18 = math.exp %17 : vector<1x8x8xf32>
    %cst_13 = arith.constant dense<0.000000e+00> : vector<1x8xf32>
    %19 = vector.multi_reduction <add>, %18, %cst_13 [2] : vector<1x8x8xf32> to vector<1x8xf32>
    %20 = vector.shape_cast %19 : vector<1x8xf32> to vector<1x8x1xf32>
    %21 = tpu.reciprocal %20 : vector<1x8x1xf32> -> vector<1x8x1xf32>
    %22 = vector.broadcast %21 : vector<1x8x1xf32> to vector<1x8x8xf32>
    %23 = arith.mulf %18, %22 : vector<1x8x8xf32>
    "tpu.trace_start"() <{level = 10 : i32, message = "bni,bid->bnd"}> : () -> ()
    %cst_14 = arith.constant dense<0.000000e+00> : vector<1x8x256xf32>
    %24 = tpu.matmul %23, %10, %cst_14 {dimension_numbers = #tpu.dot_dimension_numbers<[2], [1], [1], [2], [0, 0, 0, 1, 1, 2], [0], [0]>} : vector<1x8x8xf32>, vector<1x8x256xf32>, vector<1x8x256xf32> -> vector<1x8x256xf32>
    "tpu.trace_stop"() : () -> ()
    %c0_15 = arith.constant 0 : index
    %c0_16 = arith.constant 0 : index
    %c0_17 = arith.constant 0 : index
    %25 = vector.load %arg5[%c0_15, %c0_16, %c0_17] : memref<1x8x256xf32, #tpu.memory_space<vmem>>, vector<1x8x256xf32>
    tpu.vector_store %arg5[%c0_15, %c0_16, %c0_17], %24 {strides = array<i32>} : memref<1x8x256xf32, #tpu.memory_space<vmem>>, vector<1x8x256xf32>,
    return
  }
  func.func @transform_0(%arg0: i32) -> (i32, i32, i32) {
    %c0_i32 = arith.constant 0 : i32
    %c0_i32_0 = arith.constant 0 : i32
    %c0_i32_1 = arith.constant 0 : i32
    return %arg0, %c0_i32, %c0_i32_0 : i32, i32, i32
  }
  func.func @transform_1(%arg0: i32) -> (i32, i32) {
    %c0_i32 = arith.constant 0 : i32
    %c0_i32_0 = arith.constant 0 : i32
    %c0_i32_1 = arith.constant 0 : i32
    return %c0_i32, %c0_i32_0 : i32, i32
  }
  func.func @transform_2(%arg0: i32) -> (i32, i32) {
    %c0_i32 = arith.constant 0 : i32
    %c0_i32_0 = arith.constant 0 : i32
    %c0_i32_1 = arith.constant 0 : i32
    return %c0_i32, %c0_i32_0 : i32, i32
  }
  func.func @transform_3(%arg0: i32) -> (i32, i32) {
    %c0_i32 = arith.constant 0 : i32
    %c0_i32_0 = arith.constant 0 : i32
    %c0_i32_1 = arith.constant 0 : i32
    return %c0_i32, %c0_i32_0 : i32, i32
  }
  func.func @transform_4(%arg0: i32) -> (i32, i32, i32) {
    %c0_i32 = arith.constant 0 : i32
    %c0_i32_0 = arith.constant 0 : i32
    %c0_i32_1 = arith.constant 0 : i32
    return %arg0, %c0_i32, %c0_i32_0 : i32, i32, i32
  }
}

</mosaic_0001>

<bundles_post_ra>
// kernel: tpu_custom_call.1
= control target key start
LH: loop header
LB: loop body
LE: loop exit
PB: predicated region body
PF: predicated region fallthrough
CT: control target
= control target key end

     0   :  { %9 = vsyncpa [#allocation3], 0  ;;  %s1212_s0 = inlined_call_operand.hbm [shape: f32[2,8,128], index: 0, kind: input, shape index: {}]   ;;  %s1213_s1 = inlined_call_operand.hbm [shape: f32[128,256], index: 1, kind: input, shape index: {}]   ;;  %s1214_s2 = inlined_call_operand.hbm [shape: f32[128,256], index: 2, kind: input, shape index: {}]   ;;  %s1215_s3 = inlined_call_operand.hbm [shape: f32[128,256], index: 3, kind: input, shape index: {}]   ;;  %s1216_s4 = inlined_call_operand.hbm [shape: f32[2,8,256], index: 4, kind: output, shape index: {}]  }
   0x1   :  { %11 = vsyncpa [#allocation3 + $0x1], 0 }
   0x2   :  { %12 = vsyncpa [#allocation6], 0 }
   0x3   :  { %13 = vsyncpa [#allocation9], 0 }
   0x4   :  { %14 = vsyncpa [#allocation4], 0 }
   0x5   :  { %16 = vsyncpa [#allocation4 + $0x1], 0  ;;  %s1040_s15 = smov 0   ;;  %s1042_s16 = smov 0  }
   0x6   :  { %s1044_s17 = smov 0   ;;  %s1046_s18 = smov 0  }
   0x7 LB: > { %s153_s21 = sshll.u32 %s1213_s1, 4  ;;  %s1064_s22 = sadd.s32 4294967295, %s1008_s18   ;;  %s1008_s18 = sphi %s1046_s18, %s1227_s18   ;;  %s1004_s17 = sphi %s1044_s17, %s1226_s17   ;;  %s1000_s16 = sphi %s1042_s16, %s1225_s16   ;;  %s996_s15 = sphi %s1040_s15, %s1224_s15   ;;  %s154_s21 = int_to_ptr.hbm [resolvable:$true] %s153_s21 }
   0x8   : > { %p710_p0 = scmp.ge.s32.totalorder %s1008_s18, 1  ;;  %p43_p1 = scmp.eq.s32.totalorder %s1064_s22, 0 }
   0x9   : > { %p142_p2 = scmp.lt.s32.totalorder %s1008_s18, 3  ;;  %s1010_s24 = smov [#allocation5]  }
   0xa   : > { %s155_s25 = sshll.u32 %s1010_s24, 4  ;;  %s167_s28 = sshll.u32 %s1214_s2, 4  ;;  %s156_s25 = int_to_ptr.vmem [resolvable:$true] %s155_s25  ;;  %s168_s28 = int_to_ptr.hbm [resolvable:$true] %s167_s28 }
   0xb   : > { %p1069_p3 = pnand %p710_p0, %p142_p2  ;;  %s181_s6 = sshll.u32 %s1215_s3, 4  ;;  %s182_s6 = int_to_ptr.hbm [resolvable:$true] %s181_s6 }
   0xc   : > { %s1011_s7 = smov [#allocation7]   ;;  %s1012_s9 = smov 256  }
   0xd   : > { %p747_p4 = pneg %p1069_p3  ;;  %s169_s8 = sshll.u32 %s1011_s7, 4  ;;  %s170_s8 = int_to_ptr.vmem [resolvable:$true] %s169_s8 }
   0xe   : > { %s1013_s10 = smov 16   ;;  %s1014_s11 = smov [#allocation8]  }
   0xf   : > { %p1081_p6 = pnand %p747_p4, %p43_p1  ;;  %s183_s12 = sshll.u32 %s1014_s11, 4  ;;  %s184_s12 = int_to_ptr.vmem [resolvable:$true] %s183_s12 }
  0x10   : > { %s709_s13 = sadd.s32 4294967294, %s1008_s18   ;;  %s1096_s14 = sadd.s32 1, %s1008_s18  }
  0x11   : > { %750 = dma.hbm_to_vmem [thread:$0]  (!%p1081_p6), %s154_s21, 4096, %s156_s25, [#allocation6], %s1012_s9, %s1012_s9, %s1013_s10  }
  0x12   : > { %753 = dma.hbm_to_vmem [thread:$0]  (!%p1081_p6), %s168_s28, 4096, %s170_s8, [#allocation6], %s1012_s9, %s1012_s9, %s1013_s10  }
  0x13   : > { %756 = dma.hbm_to_vmem [thread:$0]  (!%p1081_p6), %s182_s6, 4096, %s184_s12, [#allocation9], %s1012_s9, %s1012_s9, %s1013_s10  }
  0x14   : > { %s29_s19 = sadd.s32 1, %s1004_s17  ;;  %s26_s20 = ssub.s32 %s1008_s18, %s1096_s14 }
  0x15   : > { %p36_p7 = scmp.ne.s32.totalorder %s1004_s17, %s1000_s16  ;;  %p27_p8 = scmp.eq.s32.totalorder %s26_s20, 0 }
  0x16   : > { %p37_p9 = scmp.eq.s32.totalorder %s1008_s18, 0  ;;  %p42_p10 = scmp.ne.s32.totalorder %s1000_s16, %s996_s15 }
  0x17   : > { %p129_p11 = scmp.eq.s32.totalorder %s1064_s22, 1  ;;  %p135_p0 = scmp.eq.s32.totalorder %s709_s13, 1 }
  0x18   : > { %s1108_s21 = scalar_select %p27_p8, %s1004_s17, %s29_s19  }
  0x19   : > { %p1112_p12 = por %p43_p1, %p42_p10  ;;  %p1116_p13 = por %p129_p11, %p36_p7 }
  0x1a   : > { %p38_p2 = por %p37_p9, %p36_p7  ;;  %s197_s26 = sand.u32 1, %s1004_s17  }
  0x1b   : > { %p1121_p4 = por %p135_p0, %p42_p10  ;;  %p768_p6 = scmp.lt.s32.totalorder %s1008_s18, 2 }
  0x1c   : > { %s715_s28 = sshll.u32 %s197_s26, 3  ;;  %s716_s29 = sshll.u32 %s1008_s18, 3 }
  0x1d   : > { %s205_s6 = scalar_lea.hbm %s1212_s0, %s716_s29  ;;  %s201_s8 = scalar_lea.vmem [#allocation2], %s715_s28 }
  0x1e   : > { %s207_s7 = sshll.u32 %s205_s6, 4  ;;  %s209_s9 = sshll.u32 %s201_s8, 4  ;;  %s208_s7 = int_to_ptr.hbm [resolvable:$true] %s207_s7  ;;  %s210_s9 = int_to_ptr.vmem [resolvable:$true] %s209_s9 }
  0x1f   : > { %p1130_p8 = pnand %p768_p6, %p38_p2  ;;  %s198_s11 = scalar_lea.sflag [#allocation3], %s197_s26 }
  0x20   : > { %s904_s12 = sshra.s32 %s208_s7, 4  ;;  %s911_s28 = scalar_lea.hbm %s1212_s0, 16  ;;  %s905_s12 = int_to_ptr.hbm [resolvable:$true] %s904_s12 }
  0x21   : > { %s906_s13 = scalar_lea.hbm %s905_s12, 8  ;;  %p908_p9 = pneg %p1130_p8 }
  0x22   : > { %p907_p7 = scmp.ne.s32.totalorder %s905_s12, %s906_s13  ;;  %p912_p0 = scmp.lt.s32.totalorder %s905_s12, %s1212_s0 }
  0x23   : > { %p913_p2 = scmp.lt.s32.totalorder %s911_s28, %s906_s13 }
  0x24   : > { %p909_p10 = pnand %p908_p9, %p907_p7 }
  0x25   : > { %p914_p6 = por %p913_p2, %p912_p0 }
  0x26   : > { %p910_p11 = pneg %p909_p10 }
  0x28   : > { %p915_p5 = pnand %p914_p6, %p910_p11 }
  0x2a   : > { %918 = shalt.err (!%p915_p5)
}
  0x2b   : > { %760 = dma.hbm_to_vmem [thread:$0]  (!%p1130_p8), %s208_s7, 128, %s210_s9, %s198_s11  }
  0x2c   : > { %218 = sbr.rel (%p1069_p3) target bundleno = 757 (0x2f5), region = 36  ;;  %s1147_s26 = sand.u32 (!%p1069_p3), 1, %s1000_s16  }
  0x2d   : > { %s718_s5 = sshll.u32 (!%p1069_p3), %s1147_s26, 3  ;;  %s221_s6 = scalar_lea.sflag (!%p1069_p3), [#allocation3], %s1147_s26 }
  0x2e   : > { %s1151_s8 = scalar_lea.vmem (!%p1069_p3), [#allocation2], %s718_s5 }
  0x31   : > { %979 = dma.done.wait (%p1112_p12), %s221_s6, 128  }
  0x32   : > { %981 = vsyncadd (%p1112_p12), %s221_s6, 4294967168 }
  0x33   : > { %983 = dma.done.wait (%p43_p1), [#allocation6], 8192  }
  0x34   : > { %985 = vsyncadd (%p43_p1), [#allocation6], 4294959104 }
  0x35   : > { %987 = dma.done.wait (%p43_p1), [#allocation9], 4096  }
  0x36   : > { %989 = vsyncadd (%p43_p1), [#allocation9], 4294963200  ;;  %v368_v0 = vld [vmem:[#allocation7 + $0xf0] sm:$0xff]  ;;  %v369_v1 = vld [vmem:[#allocation7 + $0xf8] sm:$0xff]  ;;  %vm523_vm0 = vcmask 64512   ;;  %s722_s23 = sshll.u32 %s1147_s26, 4 }
  0x37   : > { %v366_v2 = vld [vmem:[#allocation7 + $0xe0] sm:$0xff]  ;;  %370 = vmatpush.msra.mxu2 %v368_v0  ;;  %390 = vmatpush.msra.mxu3 %v369_v1  ;;  %v367_v3 = vld [vmem:[#allocation7 + $0xe8] sm:$0xff]  ;;  %v364_v4 = vld [vmem:[#allocation7 + $0xd0] sm:$0xff]  ;;  %s730_s24 = sshll.u32 %s1064_s22, 4  ;;  %s264_s11 = scalar_lea.vmem [#allocation10], %s722_s23 }
  0x38   : > { %v365_v5 = vld [vmem:[#allocation7 + $0xd8] sm:$0xff]  ;;  %v296_v6 = vld [vmem:[#allocation5 + $0xf0] sm:$0xff]  ;;  %v362_v8 = vld [vmem:[#allocation7 + $0xc0] sm:$0xff]  ;;  %s605_s10 = scalar_lea.hbm %s1216_s4, %s730_s24  ;;  %s607_s12 = sshll.u32 %s264_s11, 4  ;;  %s608_s12 = int_to_ptr.vmem [resolvable:$true] %s607_s12 }
  0x39   : > { %371 = vmatpush.msra.mxu2 %v366_v2  ;;  %391 = vmatpush.msra.mxu3 %v367_v3  ;;  %v297_v7 = vld [vmem:[#allocation5 + $0xf8] sm:$0xff]  ;;  %v363_v9 = vld [vmem:[#allocation7 + $0xc8] sm:$0xff]  ;;  %v294_v10 = vld [vmem:[#allocation5 + $0xe0] sm:$0xff]  ;;  %s609_s13 = sshll.u32 %s605_s10, 4  ;;  %s594_s19 = scalar_lea.sflag [#allocation4], %s1147_s26  ;;  %s610_s13 = int_to_ptr.hbm [resolvable:$true] %s609_s13 }
  0x3a   : > { %298 = vmatpush.msra.mxu0 %v296_v6  ;;  %318 = vmatpush.msra.mxu1 %v297_v7  ;;  %v360_v11 = vld [vmem:[#allocation7 + $0xb0] sm:$0xff]  ;;  %v295_v12 = vld [vmem:[#allocation5 + $0xe8] sm:$0xff]  ;;  %v361_v13 = vld [vmem:[#allocation7 + $0xb8] sm:$0xff]  ;;  %s948_s20 = sshra.s32 %s610_s13, 4  ;;  %s954_s30 = scalar_lea.hbm %s1216_s4, 32  ;;  %s949_s20 = int_to_ptr.hbm [resolvable:$true] %s948_s20 }
  0x3b   : > { %372 = vmatpush.msra.mxu2 %v364_v4  ;;  %392 = vmatpush.msra.mxu3 %v365_v5  ;;  %v292_v14 = vld [vmem:[#allocation5 + $0xd0] sm:$0xff]  ;;  %v293_v15 = vld [vmem:[#allocation5 + $0xd8] sm:$0xff]  ;;  %v290_v16 = vld [vmem:[#allocation5 + $0xc0] sm:$0xff]  ;;  %s950_s28 = scalar_lea.hbm %s949_s20, 16  ;;  %p955_p12 = scmp.lt.s32.totalorder %s949_s20, %s1216_s4 }
  0x3c   : > { %299 = vmatpush.msra.mxu0 %v294_v10  ;;  %319 = vmatpush.msra.mxu1 %v295_v12  ;;  %v291_v17 = vld [vmem:[#allocation5 + $0xc8] sm:$0xff]  ;;  %v358_v18 = vld [vmem:[#allocation7 + $0xa0] sm:$0xff]  ;;  %v288_v20 = vld [vmem:[#allocation5 + $0xb0] sm:$0xff]  ;;  %p951_p1 = scmp.ne.s32.totalorder %s949_s20, %s950_s28  ;;  %p956_p8 = scmp.lt.s32.totalorder %s954_s30, %s950_s28 }
  0x3d   : > { %373 = vmatpush.msra.mxu2 %v362_v8  ;;  %393 = vmatpush.msra.mxu3 %v363_v9  ;;  %v359_v19 = vld [vmem:[#allocation7 + $0xa8] sm:$0xff]  ;;  %v289_v21 = vld [vmem:[#allocation5 + $0xb8] sm:$0xff]  ;;  %v356_v22 = vld [vmem:[#allocation7 + $0x90] sm:$0xff] }
  0x3e   : > { %300 = vmatpush.msra.mxu0 %v292_v14  ;;  %320 = vmatpush.msra.mxu1 %v293_v15  ;;  %v357_v23 = vld [vmem:[#allocation7 + $0x98] sm:$0xff]  ;;  %v286_v24 = vld [vmem:[#allocation5 + $0xa0] sm:$0xff]  ;;  %v287_v25 = vld [vmem:[#allocation5 + $0xa8] sm:$0xff]  ;;  %p952_p3 = pnand %p951_p1, %p1116_p13  ;;  %p957_p7 = por %p956_p8, %p955_p12 }
  0x3f   : > { %374 = vmatpush.msra.mxu2 %v360_v11  ;;  %394 = vmatpush.msra.mxu3 %v361_v13  ;;  %v354_v26 = vld [vmem:[#allocation7 + $0x80] sm:$0xff]  ;;  %v355_v27 = vld [vmem:[#allocation7 + $0x88] sm:$0xff]  ;;  %v284_v28 = vld [vmem:[#allocation5 + $0x90] sm:$0xff] }
  0x40   : > { %301 = vmatpush.msra.mxu0 %v290_v16  ;;  %321 = vmatpush.msra.mxu1 %v291_v17  ;;  %v285_v29 = vld [vmem:[#allocation5 + $0x98] sm:$0xff]  ;;  %v352_v30 = vld [vmem:[#allocation7 + $0x70] sm:$0xff]  ;;  %v282_v32 = vld [vmem:[#allocation5 + $0x80] sm:$0xff]  ;;  %p953_p5 = pneg %p952_p3 }
  0x41   : > { %375 = vmatpush.msra.mxu2 %v358_v18  ;;  %395 = vmatpush.msra.mxu3 %v359_v19  ;;  %v353_v31 = vld [vmem:[#allocation7 + $0x78] sm:$0xff]  ;;  %v283_v33 = vld [vmem:[#allocation5 + $0x88] sm:$0xff]  ;;  %v350_v34 = vld [vmem:[#allocation7 + $0x60] sm:$0xff] }
  0x42   : > { %302 = vmatpush.msra.mxu0 %v288_v20  ;;  %322 = vmatpush.msra.mxu1 %v289_v21  ;;  %v351_v35 = vld [vmem:[#allocation7 + $0x68] sm:$0xff]  ;;  %v280_v36 = vld [vmem:[#allocation5 + $0x70] sm:$0xff]  ;;  %v281_v37 = vld [vmem:[#allocation5 + $0x78] sm:$0xff]  ;;  %p958_p9 = pnand %p957_p7, %p953_p5 }
  0x43   : > { %376 = vmatpush.msra.mxu2 %v356_v22  ;;  %396 = vmatpush.msra.mxu3 %v357_v23  ;;  %v348_v38 = vld [vmem:[#allocation7 + $0x50] sm:$0xff]  ;;  %v349_v39 = vld [vmem:[#allocation7 + $0x58] sm:$0xff]  ;;  %v278_v40 = vld [vmem:[#allocation5 + $0x60] sm:$0xff] }
  0x44   : > { %303 = vmatpush.msra.mxu0 %v286_v24  ;;  %323 = vmatpush.msra.mxu1 %v287_v25  ;;  %v279_v41 = vld [vmem:[#allocation5 + $0x68] sm:$0xff]  ;;  %v346_v42 = vld [vmem:[#allocation7 + $0x40] sm:$0xff]  ;;  %v276_v44 = vld [vmem:[#allocation5 + $0x50] sm:$0xff] }
  0x45   : > { %377 = vmatpush.msra.mxu2 %v354_v26  ;;  %397 = vmatpush.msra.mxu3 %v355_v27  ;;  %v347_v43 = vld [vmem:[#allocation7 + $0x48] sm:$0xff]  ;;  %v277_v45 = vld [vmem:[#allocation5 + $0x58] sm:$0xff]  ;;  %v344_v46 = vld [vmem:[#allocation7 + $0x30] sm:$0xff] }
  0x46   : > { %304 = vmatpush.msra.mxu0 %v284_v28  ;;  %324 = vmatpush.msra.mxu1 %v285_v29  ;;  %v345_v47 = vld [vmem:[#allocation7 + $0x38] sm:$0xff]  ;;  %v274_v48 = vld [vmem:[#allocation5 + $0x40] sm:$0xff]  ;;  %v275_v49 = vld [vmem:[#allocation5 + $0x48] sm:$0xff] }
  0x47   : > { %378 = vmatpush.msra.mxu2 %v352_v30  ;;  %398 = vmatpush.msra.mxu3 %v353_v31  ;;  %v342_v50 = vld [vmem:[#allocation7 + $0x20] sm:$0xff]  ;;  %v343_v51 = vld [vmem:[#allocation7 + $0x28] sm:$0xff]  ;;  %v272_v52 = vld [vmem:[#allocation5 + $0x30] sm:$0xff] }
  0x48   : > { %305 = vmatpush.msra.mxu0 %v282_v32  ;;  %325 = vmatpush.msra.mxu1 %v283_v33  ;;  %v273_v53 = vld [vmem:[#allocation5 + $0x38] sm:$0xff]  ;;  %v340_v54 = vld [vmem:[#allocation7 + $0x10] sm:$0xff]  ;;  %v270_v56 = vld [vmem:[#allocation5 + $0x20] sm:$0xff] }
  0x49   : > { %379 = vmatpush.msra.mxu2 %v350_v34  ;;  %399 = vmatpush.msra.mxu3 %v351_v35  ;;  %v341_v55 = vld [vmem:[#allocation7 + $0x18] sm:$0xff]  ;;  %v271_v57 = vld [vmem:[#allocation5 + $0x28] sm:$0xff]  ;;  %v338_v58 = vld [vmem:[#allocation7] sm:$0xff] }
  0x4a   : > { %306 = vmatpush.msra.mxu0 %v280_v36  ;;  %326 = vmatpush.msra.mxu1 %v281_v37  ;;  %v339_v59 = vld [vmem:[#allocation7 + $0x8] sm:$0xff]  ;;  %v1166_v60 = vld [vmem:[%s1151_s8] sm:$0xff]  ;;  %v266_v63 = vld [vmem:[#allocation5] sm:$0xff] }
  0x4b   : > { %380 = vmatpush.msra.mxu2 %v348_v38  ;;  %400 = vmatpush.msra.mxu3 %v349_v39  ;;  %v268_v61 = vld [vmem:[#allocation5 + $0x10] sm:$0xff]  ;;  %v269_v62 = vld [vmem:[#allocation5 + $0x18] sm:$0xff]  ;;  %v267_v0 = vld [vmem:[#allocation5 + $0x8] sm:$0xff] }
  0x4c   : > { %307 = vmatpush.msra.mxu0 %v278_v40  ;;  %327 = vmatpush.msra.mxu1 %v279_v41  ;;  %v440_v5 = vld [vmem:[#allocation8 + $0xf0] sm:$0xff]  ;;  %v441_v6 = vld [vmem:[#allocation8 + $0xf8] sm:$0xff]  ;;  %v438_v7 = vld [vmem:[#allocation8 + $0xe0] sm:$0xff] }
  0x4d   : > { %381 = vmatpush.msra.mxu2 %v346_v42  ;;  %401 = vmatpush.msra.mxu3 %v347_v43  ;;  %v439_v8 = vld [vmem:[#allocation8 + $0xe8] sm:$0xff]  ;;  %v436_v9 = vld [vmem:[#allocation8 + $0xd0] sm:$0xff]  ;;  %v437_v10 = vld [vmem:[#allocation8 + $0xd8] sm:$0xff] }
  0x4e   : > { %308 = vmatpush.msra.mxu0 %v276_v44  ;;  %328 = vmatpush.msra.mxu1 %v277_v45  ;;  %v434_v11 = vld [vmem:[#allocation8 + $0xc0] sm:$0xff]  ;;  %v435_v12 = vld [vmem:[#allocation8 + $0xc8] sm:$0xff]  ;;  %v432_v13 = vld [vmem:[#allocation8 + $0xb0] sm:$0xff] }
  0x4f   : > { %382 = vmatpush.msra.mxu2 %v344_v46  ;;  %402 = vmatpush.msra.mxu3 %v345_v47  ;;  %v433_v14 = vld [vmem:[#allocation8 + $0xb8] sm:$0xff]  ;;  %v430_v15 = vld [vmem:[#allocation8 + $0xa0] sm:$0xff]  ;;  %v431_v16 = vld [vmem:[#allocation8 + $0xa8] sm:$0xff] }
  0x50   : > { %309 = vmatpush.msra.mxu0 %v274_v48  ;;  %329 = vmatpush.msra.mxu1 %v275_v49  ;;  %v428_v17 = vld [vmem:[#allocation8 + $0x90] sm:$0xff]  ;;  %v429_v18 = vld [vmem:[#allocation8 + $0x98] sm:$0xff]  ;;  %v426_v24 = vld [vmem:[#allocation8 + $0x80] sm:$0xff] }
  0x51   : > { %383 = vmatpush.msra.mxu2 %v342_v50  ;;  %403 = vmatpush.msra.mxu3 %v343_v51  ;;  %v427_v25 = vld [vmem:[#allocation8 + $0x88] sm:$0xff]  ;;  %v424_v26 = vld [vmem:[#allocation8 + $0x70] sm:$0xff]  ;;  %v425_v27 = vld [vmem:[#allocation8 + $0x78] sm:$0xff] }
  0x52   : > { %310 = vmatpush.msra.mxu0 %v272_v52  ;;  %330 = vmatpush.msra.mxu1 %v273_v53  ;;  %v422_v28 = vld [vmem:[#allocation8 + $0x60] sm:$0xff]  ;;  %v423_v29 = vld [vmem:[#allocation8 + $0x68] sm:$0xff]  ;;  %v420_v30 = vld [vmem:[#allocation8 + $0x50] sm:$0xff] }
  0x53   : > { %384 = vmatpush.msra.mxu2 %v340_v54  ;;  %404 = vmatpush.msra.mxu3 %v341_v55  ;;  %v421_v31 = vld [vmem:[#allocation8 + $0x58] sm:$0xff]  ;;  %v418_v32 = vld [vmem:[#allocation8 + $0x40] sm:$0xff]  ;;  %v419_v33 = vld [vmem:[#allocation8 + $0x48] sm:$0xff] }
  0x54   : > { %311 = vmatpush.msra.mxu0 %v270_v56  ;;  %331 = vmatpush.msra.mxu1 %v271_v57  ;;  %v416_v34 = vld [vmem:[#allocation8 + $0x30] sm:$0xff]  ;;  %v417_v35 = vld [vmem:[#allocation8 + $0x38] sm:$0xff]  ;;  %v414_v36 = vld [vmem:[#allocation8 + $0x20] sm:$0xff] }
  0x55   : > { %385 = vmatpush.msra.mxu2 %v338_v58  ;;  %405 = vmatpush.msra.mxu3 %v339_v59  ;;  %v415_v37 = vld [vmem:[#allocation8 + $0x28] sm:$0xff]  ;;  %v412_v38 = vld [vmem:[#allocation8 + $0x10] sm:$0xff]  ;;  %v413_v39 = vld [vmem:[#allocation8 + $0x18] sm:$0xff] }
  0x56   : > { %386 = vmatmul.f32.vlgmr.msra.gmra.mxu2 %v1166_v60  ;;  %406 = vmatmul.f32.vlgmr.msra.gmra.mxu3 %v1166_v60  ;;  %v410_v40 = vld [vmem:[#allocation8] sm:$0xff]  ;;  %v411_v41 = vld [vmem:[#allocation8 + $0x8] sm:$0xff] }
  0x57   : > { %312 = vmatpush.msra.mxu0 %v268_v61  ;;  %332 = vmatpush.msra.mxu1 %v269_v62 }
  0x59   : > { %313 = vmatpush.msra.mxu0 %v266_v63  ;;  %333 = vmatpush.msra.mxu1 %v267_v0 }
  0x5a   : > { %314 = vmatmul.f32.vlgmr.msra.gmra.mxu0 %v1166_v60  ;;  %334 = vmatmul.f32.vlgmr.msra.gmra.mxu1 %v1166_v60 }
  0x5b   : > { %442 = vmatpush.msrb.mxu0 %v440_v5  ;;  %462 = vmatpush.msrb.mxu1 %v441_v6 }
  0x5d   : > { %443 = vmatpush.msrb.mxu0 %v438_v7  ;;  %463 = vmatpush.msrb.mxu1 %v439_v8 }
  0x5f   : > { %444 = vmatpush.msrb.mxu0 %v436_v9  ;;  %464 = vmatpush.msrb.mxu1 %v437_v10 }
  0x61   : > { %445 = vmatpush.msrb.mxu0 %v434_v11  ;;  %465 = vmatpush.msrb.mxu1 %v435_v12 }
  0x63   : > { %446 = vmatpush.msrb.mxu0 %v432_v13  ;;  %466 = vmatpush.msrb.mxu1 %v433_v14 }
  0x65   : > { %447 = vmatpush.msrb.mxu0 %v430_v15  ;;  %467 = vmatpush.msrb.mxu1 %v431_v16 }
  0x67   : > { %448 = vmatpush.msrb.mxu0 %v428_v17  ;;  %468 = vmatpush.msrb.mxu1 %v429_v18 }
  0x69   : > { %449 = vmatpush.msrb.mxu0 %v426_v24  ;;  %469 = vmatpush.msrb.mxu1 %v427_v25 }
  0x6b   : > { %450 = vmatpush.msrb.mxu0 %v424_v26  ;;  %470 = vmatpush.msrb.mxu1 %v425_v27 }
  0x6d   : > { %451 = vmatpush.msrb.mxu0 %v422_v28  ;;  %471 = vmatpush.msrb.mxu1 %v423_v29 }
  0x6f   : > { %452 = vmatpush.msrb.mxu0 %v420_v30  ;;  %472 = vmatpush.msrb.mxu1 %v421_v31 }
  0x71   : > { %453 = vmatpush.msrb.mxu0 %v418_v32  ;;  %473 = vmatpush.msrb.mxu1 %v419_v33 }
  0x73   : > { %454 = vmatpush.msrb.mxu0 %v416_v34  ;;  %474 = vmatpush.msrb.mxu1 %v417_v35 }
  0x75   : > { %455 = vmatpush.msrb.mxu0 %v414_v36  ;;  %475 = vmatpush.msrb.mxu1 %v415_v37 }
  0x77   : > { %456 = vmatpush.msrb.mxu0 %v412_v38  ;;  %476 = vmatpush.msrb.mxu1 %v413_v39 }
  0x79   : > { %457 = vmatpush.msrb.mxu0 %v410_v40  ;;  %477 = vmatpush.msrb.mxu1 %v411_v41 }
  0x7a   : > { %458 = vmatmul.f32.vlgmr.msrb.gmra.mxu0 %v1166_v60  ;;  %478 = vmatmul.f32.vlgmr.msrb.gmra.mxu1 %v1166_v60 }
  0xd7   : > { %v315_v3 = vpop.f32.mrf.mxu0  ;;  %v335_v4 = vpop.f32.mrf.mxu1 }
  0xd9   : > { %v387_v1 = vpop.f32.mrf.mxu2  ;;  %v407_v2 = vpop.f32.mrf.mxu3 }
  0xda   : > { %497 = vmatpush.xpose.msrb.mxu2 %v387_v1  ;;  %517 = vmatpush.xpose.msrb.mxu3 %v407_v2 }
  0xdd   : > { %498 = vmatmul.f32.vlgmr.msrb.gmra.mxu2 %v315_v3  ;;  %518 = vmatmul.f32.vlgmr.msrb.gmra.mxu3 %v335_v4 }
  0xf7   : > { %v459_v47 = vpop.f32.mrf.mxu0  ;;  %v479_v48 = vpop.f32.mrf.mxu1 }
  0xf8   : > { %566 = vmatpush.msra.mxu2 %v459_v47  ;;  %586 = vmatpush.msra.mxu3 %v479_v48 }
 0x160   : > { %v499_v19 = vpop.f32.mrf.mxu2  ;;  %v519_v20 = vpop.f32.mrf.mxu3 }
 0x161   : > { %v520_v21 = vadd.f32 %v519_v20, %v499_v19 }
 0x163   : > { %v522_v22 = vmul.f32 0.17677669, %v520_v21 }
 0x165   : > { %v524_v23 = vsel %vm523_vm0, %v522_v22, -inf }
 0x166   : > { %525 = vmax.xlane.f32.xlu0 %v524_v23 }
 0x1d9   : > { %v526_v42 = vpop.xlane.xlu0 %525 }
 0x1da   : > { %v527_v43 = vsub.f32 %v522_v22, %v526_v42 }
 0x1dc   : > { %v528_v44 = vmul.f32 1.442695, %v527_v43 }
 0x1de   : > { %810 = vpow2.f32 %v528_v44 }
 0x1e4   : > { %v811_v45 = vpop.eup %810 }
 0x1e5   : > { %v530_v46 = vsel %vm523_vm0, %v811_v45, 0.0 }
 0x1e6   : > { %531 = vadd.xlane.f32.xlu0 %v530_v46 }
 0x259   : > { %v532_v49 = vpop.xlane.xlu0 %531 }
 0x25a   : > { %812 = vrcp.f32 %v532_v49  ;;  %v544_v53 = vand.u32 2147483648, %v532_v49  ;;  %v542_v55 = vand.u32 2147483647, %v532_v49  ;;  %vm538_vm2 = vweird.f32 %v532_v49 }
 0x25c   : > { %v545_v57 = vor.u32 1.1754944e-38, %v544_v53  ;;  %vm543_vm4 = vcmp.eq.f32.partialorder %v542_v55, 8.507059e+37 }
 0x260   : > { %v813_v50 = vpop.eup %812 }
 0x261   : > { %v534_v51 = vmul.f32 %v813_v50, %v532_v49  ;;  %vm539_vm1 = vweird.f32 %v813_v50 }
 0x262   : > { %vm540_vm3 = vmor %vm538_vm2, %vm539_vm1 }
 0x263   : > { %v535_v52 = vsub.f32 1.0, %v534_v51 }
 0x265   : > { %v536_v54 = vmul.f32 %v813_v50, %v535_v52 }
 0x267   : > { %v537_v56 = vadd.f32 %v813_v50, %v536_v54 }
 0x269   : > { %v541_v58 = vsel %vm540_vm3, %v813_v50, %v537_v56 }
 0x26a   : > { %v546_v59 = vsel %vm543_vm4, %v545_v57, %v541_v58 }
 0x26b   : > { %v547_v60 = vmul.f32 %v811_v45, %v546_v59 }
 0x26d   : > { %723 = vmatmul.msk.f32.vlgmr.msra.gmra.mxu2 %vm523_vm0, %v547_v60  ;;  %724 = vmatmul.msk.f32.vlgmr.msra.gmra.mxu3 %vm523_vm0, %v547_v60 }
 0x2f0   : > { %v568_v61 = vpop.f32.mrf.mxu2  ;;  %v588_v62 = vpop.f32.mrf.mxu3 }
 0x2f1   : > { %591 = vst [vmem:[%s264_s11] sm:$0xff] %v568_v61 }
 0x2f2   : > { %592 = vst [vmem:[%s264_s11 + $0x8] sm:$0xff] %v588_v62 }
 0x2f3   : > { %961 = shalt.err (!%p958_p9)
}
 0x2f4   : > { %745 = dma.vmem_to_hbm [thread:$0]  (%p1116_p13), %s608_s12, 256, %s610_s13, %s594_s19  }
 0x2f5 PF: > { %s621_s26 = sand.u32 1, %s996_s15   ;;  %p1223_p10 = scmp.ge.s32.totalorder %s1008_s18, 2 }
 0x2f6   : > { %s622_s8 = scalar_lea.sflag [#allocation4], %s621_s26 }
 0x2f7   : > { %p762_p11 = pnand %p1223_p10, %p1121_p4 }
 0x2f9   : > { %p763_p0 = pneg %p762_p11 }
 0x2fb   : > { %991 = dma.done.wait (%p763_p0), %s622_s8, 256  }
 0x2fc   : > { %993 = vsyncadd (%p763_p0), %s622_s8, 4294967040  ;;  %p19_p2 = scmp.ge.s32.totalorder %s1096_s14, 4   ;;  %s1224_s15 = smov %s1000_s16 }
 0x2fd   : > { %s1225_s16 = smov %s1004_s17  ;;  %s1226_s17 = smov %s1108_s21 }
 0x2fe   : > { %s1227_s18 = smov %s1096_s14  ;;  %21 = sbr.rel (!%p19_p2) target bundleno = 7 (0x7), region = 93 }
 0x303   :  { %628 = vsyncpa [#allocation3], 1 }
 0x304   :  { %630 = vsyncpa [#allocation3 + $0x1], 1 }
 0x305   :  { %631 = vsyncpa [#allocation6], 1 }
 0x306   :  { %632 = vsyncpa [#allocation9], 1 }
 0x307   :  { %633 = vsyncpa [#allocation4], 1 }
 0x308   :  { %635 = vsyncpa [#allocation4 + $0x1], 1 }

</bundles_post_ra>
